<compile_context>
chip_gen: v5e
topology: v5e:2x2
jax: 0.10.0
libtpu: 0.0.40
codegen_flags: <defaults>
</compile_context>

<pallas_src>
import jax
import jax.numpy as jnp
from jax.experimental import pallas as pl
from jax.experimental.pallas import tpu as pltpu


def _conv1x1_kernel(w_ref, x_ref, b_ref, o_ref):
    # w_ref: (Cout, Cin)   x_ref: (Cin, tm)   b_ref: (Cout, 1)   o_ref: (Cout, tm)
    acc = jnp.dot(w_ref[...], x_ref[...], preferred_element_type=jnp.float32)
    o_ref[...] = (acc + b_ref[...]).astype(o_ref.dtype)


def conv1x1_channels_first(x_nchw, w, b, *, tm_target=512):
    """1x1 conv, channels-first.

    x_nchw: (N, C, H, W)   w: (Cout, Cin)   b: (Cout,)
    Returns (N, Cout, H*W) in x's dtype (f32 accumulation inside).
    """
    N, C, H, W = x_nchw.shape
    Cout = w.shape[0]
    HW = H * W
    x = x_nchw.reshape(N, C, HW)          # free: native NCHW flatten

    # Lane-dense pixel tile: multiple of 128 where possible; pad the tail.
    if HW >= 128:
        tm = min(tm_target, HW)
        tm = (tm // 128) * 128
        hw_pad = pl.cdiv(HW, tm) * tm
    else:
        tm, hw_pad = HW, HW               # tiny spatial: single full-extent block
    if hw_pad != HW:
        x = jnp.pad(x, ((0, 0), (0, 0), (0, hw_pad - HW)))

    wk = w.astype(x.dtype)                # weight in compute dtype (bf16 ok)
    b2 = b.astype(jnp.float32).reshape(Cout, 1)   # bias add stays f32

    # Grid: (batch, pixel-tiles). Both axes fully parallel (disjoint outputs);
    # on v7x keep tm modest enough that the grid has several steps per core.
    y = pl.pallas_call(
        _conv1x1_kernel,
        out_shape=jax.ShapeDtypeStruct((N, Cout, hw_pad), x.dtype),
        grid_spec=pltpu.PrefetchScalarGridSpec(
            num_scalar_prefetch=0,
            grid=(N, hw_pad // tm),
            in_specs=[
                pl.BlockSpec((Cout, C), lambda n, m: (0, 0)),      # resident weight
                pl.BlockSpec((None, C, tm), lambda n, m: (n, 0, m)),
                pl.BlockSpec((Cout, 1), lambda n, m: (0, 0)),      # resident bias
            ],
            out_specs=pl.BlockSpec((None, Cout, tm), lambda n, m: (n, 0, m)),
        ),
        compiler_params=pltpu.CompilerParams(
            dimension_semantics=("parallel", "parallel"),
        ),
    )(wk, x, b2)

    if hw_pad != HW:
        y = y[:, :, :HW]
    return y


def sub_pixel_upsample(x_nchw, w, b, *, r=2, tm_target=512):
    """x_nchw: (N, C, H, W). w: (C*r*r, C). b: (C*r*r,). Returns (N, C, H*r, W*r)."""
    N, C, H, W = x_nchw.shape
    Cout, Cin = w.shape
    assert Cin == C and Cout == C * r * r

    y = conv1x1_channels_first(x_nchw, w, b, tm_target=tm_target)  # (N, Cout, H*W)

    # Kernel output is already grouped as (N, C, r, r, H, W) because
    # Cout rows are ordered c*r*r + i*r + j. Only the final pixel-shuffle
    # interleave remains (single XLA transpose on the upsampled tensor).
    y = y.reshape(N, C, r, r, H, W)
    y = jnp.transpose(y, (0, 1, 4, 2, 5, 3))                       # (N,C,H,ri,W,rj)
    return y.reshape(N, C, H * r, W * r)


def _reference(x_nchw, w, b, *, r=2):
    """Plain-JAX reference of 1x1 conv + PixelShuffle (matches PyTorch)."""
    N, C, H, W = x_nchw.shape
    y = jnp.einsum("nchw,dc->ndhw", x_nchw, w) + b[None, :, None, None]
    y = y.reshape(N, C, r, r, H, W)
    y = jnp.transpose(y, (0, 1, 4, 2, 5, 3))
    return y.reshape(N, C, H * r, W * r)


if __name__ == "__main__":
    key = jax.random.PRNGKey(0)
    N, C, H, W, r = 2, 4, 16, 16, 2
    Cout = C * r * r

    kx, kw, kb = jax.random.split(key, 3)
    x = jax.random.normal(kx, (N, C, H, W), dtype=jnp.float32)
    # PyTorch Conv2d weight layout (Cout, Cin) for a 1x1 kernel; "kaiming-ish" init.
    w = jax.random.normal(kw, (Cout, C), dtype=jnp.float32) * (1.0 / jnp.sqrt(C))
    b = jax.random.normal(kb, (Cout,), dtype=jnp.float32) * 0.1

    # f32 path
    out = sub_pixel_upsample(x, w, b, r=r)
    out = jax.block_until_ready(out)
    ref = _reference(x, w, b, r=r)
    assert out.shape == (N, C, H * r, W * r), out.shape
    assert jnp.allclose(out, ref, atol=1e-4, rtol=1e-4), "f32 mismatch vs reference"

    # bf16 I/O path (halves HBM traffic; accumulation stays f32 in-kernel)
    out_bf16 = sub_pixel_upsample(x.astype(jnp.bfloat16), w.astype(jnp.bfloat16), b, r=r)
    out_bf16 = jax.block_until_ready(out_bf16)
    assert out_bf16.shape == (N, C, H * r, W * r)
    assert jnp.allclose(out_bf16.astype(jnp.float32), ref, atol=2e-1, rtol=1e-1), \
        "bf16 mismatch vs reference"

    print("KERNEL_OK")
</pallas_src>

<mosaic_0001>
module attributes {stable_mosaic.version = 11 : i64} {
  func.func @_conv1x1_kernel(%arg0: i32, %arg1: i32, %arg2: memref<16x4xf32, #tpu.memory_space<vmem>>, %arg3: memref<1x4x256xf32, #tpu.memory_space<vmem>>, %arg4: memref<16x1xf32, #tpu.memory_space<vmem>>, %arg5: memref<1x16x256xf32, #tpu.memory_space<vmem>>) attributes {dimension_semantics = [#tpu.dimension_semantics<parallel>, #tpu.dimension_semantics<parallel>], iteration_bounds = array<i64: 2, 1>, scalar_prefetch = 0 : i64, scratch_operands = 0 : i64, tpu.core_type = #tpu.core_type<tc>, window_params = [{pipeline_mode = #tpu.pipeline_mode<synchronous>, transform_indices = @transform_0, window_bounds = array<i64: 16, 4>}, {transform_indices = @transform_1, window_bounds = array<i64: 1, 4, 256>}, {pipeline_mode = #tpu.pipeline_mode<synchronous>, transform_indices = @transform_2, window_bounds = array<i64: 16, 1>}, {transform_indices = @transform_3, window_bounds = array<i64: 1, 16, 256>}]} {
    %c0 = arith.constant 0 : index
    %c0_0 = arith.constant 0 : index
    %0 = vector.load %arg2[%c0, %c0_0] : memref<16x4xf32, #tpu.memory_space<vmem>>, vector<16x4xf32>
    %c0_1 = arith.constant 0 : index
    %c0_2 = arith.constant 0 : index
    %c0_3 = arith.constant 0 : index
    %1 = vector.load %arg3[%c0_1, %c0_2, %c0_3] : memref<1x4x256xf32, #tpu.memory_space<vmem>>, vector<1x4x256xf32>
    %2 = vector.shape_cast %1 : vector<1x4x256xf32> to vector<4x256xf32>
    %cst = arith.constant dense<0.000000e+00> : vector<16x256xf32>
    %3 = tpu.matmul %0, %2, %cst {dimension_numbers = #tpu.dot_dimension_numbers<[1], [0], [0], [1], [0, 0, 1, 1], [], []>} : vector<16x4xf32>, vector<4x256xf32>, vector<16x256xf32> -> vector<16x256xf32>
    %c0_4 = arith.constant 0 : index
    %c0_5 = arith.constant 0 : index
    %4 = vector.load %arg4[%c0_4, %c0_5] : memref<16x1xf32, #tpu.memory_space<vmem>>, vector<16x1xf32>
    %5 = vector.broadcast %4 : vector<16x1xf32> to vector<16x256xf32>
    %6 = arith.addf %3, %5 : vector<16x256xf32>
    %c0_6 = arith.constant 0 : index
    %c0_7 = arith.constant 0 : index
    %c0_8 = arith.constant 0 : index
    %7 = vector.load %arg5[%c0_6, %c0_7, %c0_8] : memref<1x16x256xf32, #tpu.memory_space<vmem>>, vector<1x16x256xf32>
    %8 = vector.shape_cast %7 : vector<1x16x256xf32> to vector<16x256xf32>
    %9 = vector.shape_cast %6 : vector<16x256xf32> to vector<1x16x256xf32>
    tpu.vector_store %arg5[%c0_6, %c0_7, %c0_8], %9 {strides = array<i32>} : memref<1x16x256xf32, #tpu.memory_space<vmem>>, vector<1x16x256xf32>,
    return
  }
  func.func @transform_0(%arg0: i32, %arg1: i32) -> (i32, i32) {
    %c0_i32 = arith.constant 0 : i32
    %c0_i32_0 = arith.constant 0 : i32
    %c0_i32_1 = arith.constant 0 : i32
    return %c0_i32, %c0_i32_0 : i32, i32
  }
  func.func @transform_1(%arg0: i32, %arg1: i32) -> (i32, i32, i32) {
    %c0_i32 = arith.constant 0 : i32
    %c0_i32_0 = arith.constant 0 : i32
    return %arg0, %c0_i32, %arg1 : i32, i32, i32
  }
  func.func @transform_2(%arg0: i32, %arg1: i32) -> (i32, i32) {
    %c0_i32 = arith.constant 0 : i32
    %c0_i32_0 = arith.constant 0 : i32
    %c0_i32_1 = arith.constant 0 : i32
    return %c0_i32, %c0_i32_0 : i32, i32
  }
  func.func @transform_3(%arg0: i32, %arg1: i32) -> (i32, i32, i32) {
    %c0_i32 = arith.constant 0 : i32
    %c0_i32_0 = arith.constant 0 : i32
    return %arg0, %c0_i32, %arg1 : i32, i32, i32
  }
}

</mosaic_0001>

<bundles_post_ra>
// kernel: tpu_custom_call.1
= control target key start
LH: loop header
LB: loop body
LE: loop exit
PB: predicated region body
PF: predicated region fallthrough
CT: control target
= control target key end

     0   :  { %8 = vsyncpa [#allocation3], 0  ;;  %s672_s0 = inlined_call_operand.vmem [shape: f32[16,4], index: 0, kind: input, shape index: {}]   ;;  %s673_s1 = inlined_call_operand.vmem [shape: f32[2,4,256], index: 1, kind: input, shape index: {}]   ;;  %s674_s2 = inlined_call_operand.vmem [shape: f32[16,1], index: 2, kind: input, shape index: {}]   ;;  %s675_s3 = inlined_call_operand.hbm [shape: f32[2,16,256], index: 3, kind: output, shape index: {}]  }
   0x1   :  { %10 = vsyncpa [#allocation3 + $0x1], 0  ;;  %s563_s12 = smov 0   ;;  %s565_s13 = smov 0  }
   0x2   :  { %s567_s14 = smov 0   ;;  %s569_s15 = smov 0  }
   0x3   :  { %s571_s16 = smov 0   ;;  %s573_s17 = smov 0  }
   0x4 LB: > { %s378_s18 = sadd.s32 4294967295, %s538_s17   ;;  %s379_s19 = sadd.s32 4294967294, %s538_s17   ;;  %s538_s17 = sphi %s573_s17, %s16_s17   ;;  %s534_s16 = sphi %s571_s16, %s682_s16   ;;  %s530_s15 = sphi %s569_s15, %s681_s15   ;;  %s526_s14 = sphi %s567_s14, %s680_s14   ;;  %s522_s13 = sphi %s565_s13, %s679_s13   ;;  %s518_s12 = sphi %s563_s12, %s678_s12  }
   0x5   : > { %s28_s20 = sadd.s32 1, %s534_s16  ;;  %s107_s21 = sadd.s32 1, %s526_s14 }
   0x6   : > { %p30_p0 = scmp.ge.s32.totalorder %s28_s20, 2  ;;  %p117_p1 = scmp.ne.s32.totalorder %s526_s14, %s522_s13 }
   0x7   : > { %p118_p2 = scmp.eq.s32.totalorder %s378_s18, 1  ;;  %p123_p3 = scmp.ne.s32.totalorder %s522_s13, %s518_s12 }
   0x8   : > { %s684_s20 = smov (%p30_p0, %s28_s20), 0  ;;  %p124_p5 = scmp.eq.s32.totalorder %s379_s19, 1 }
   0x9   : > { %p603_p4 = por %p118_p2, %p117_p1  ;;  %s102_s23 = ssub.s32 %s534_s16, %s684_s20 }
   0xa   : > { %p382_p6 = scmp.ge.s32.totalorder %s538_s17, 1  ;;  %p105_p7 = scmp.eq.s32.totalorder %s102_s23, 0 }
   0xb   : > { %p610_p8 = por %p124_p5, %p123_p3  ;;  %p161_p9 = scmp.lt.s32.totalorder %s538_s17, 3 }
   0xc   : > { %s616_s25 = scalar_select %p105_p7, %s526_s14, %s107_s21  }
   0xd   : > { %p162_p10 = pnand %p382_p6, %p161_p9 }
   0xe   : > { %p190_p11 = scmp.lt.s32.totalorder (!%p162_p10), %s530_s15, 1  ;;  %s186_s18 = sand.u32 (!%p162_p10), 1, %s522_s13  }
   0xf   : > { %165 = sbr.rel (%p162_p10) target bundleno = 174 (0xae), region = 32  ;;  %s383_s19 = sshll.u32 (!%p162_p10), %s186_s18, 5 }
  0x10   : > { %s398_s21 = sshll.u32 (!%p162_p10), %s530_s15, 5  ;;  %s480_s8 = scalar_lea.hbm (!%p162_p10), %s675_s3, 64 }
  0x11   : > { %s295_s27 = scalar_lea.hbm (!%p162_p10), %s675_s3, %s398_s21 }
  0x12   : > { %s298_s30 = sshll.u32 (!%p162_p10), %s295_s27, 4  ;;  %s299_s30 = int_to_ptr.hbm [resolvable:$true] %s298_s30 }
  0x13   : > { %s474_s4 = sshra.s32 (!%p162_p10), %s299_s30, 4  ;;  %s475_s4 = int_to_ptr.hbm [resolvable:$true] %s474_s4 }
  0x14   : > { %v540_v0 = vmov 0   ;;  %v203_v1 = vld [vmem:[%s674_s2] sm:$0xff]  ;;  %s191_s28 = scalar_select %p190_p11, %s530_s15, 1  ;;  %v204_v3 = vld [vmem:[%s674_s2 + $0x8] sm:$0xff]  ;;  %vm226_vm0 = vcmask 1043456   ;;  %vm219_vm1 = vcmask 31744  }
  0x15   : > { %459 = vset.pattern.permute.xlu0 %v540_v0  ;;  %v200_v4 = vld [vmem:[%s672_s0] sm:$0xff]  ;;  %v201_v5 = vld [vmem:[%s672_s0 + $0x8] sm:$0xff]  ;;  %s282_s15 = scalar_lea.sflag [#allocation3], %s186_s18  ;;  %p481_p1 = scmp.lt.s32.totalorder %s475_s4, %s675_s3 }
  0x16   : > { %207 = vperm.xlu0 %459, %v203_v1   ;;  %s397_s29 = sshll.u32 %s191_s28, 3  ;;  %s188_s28 = scalar_lea.vmem [#allocation2], %s383_s19 }
  0x17   : > { %s197_s5 = scalar_lea.vmem %s673_s1, %s397_s29  ;;  %s296_s29 = sshll.u32 %s188_s28, 4  ;;  %s297_s29 = int_to_ptr.vmem [resolvable:$true] %s296_s29 }
  0x18   : > { %v202_v2 = vld [vmem:[%s197_s5] sm:$0xff]  ;;  %s476_s5 = scalar_lea.hbm %s475_s4, 32 }
  0x19   : > { %216 = vst [vmem:[#allocation1] ss:$2 sm:$0xff] %v202_v2  ;;  %p477_p12 = scmp.ne.s32.totalorder %s475_s4, %s476_s5  ;;  %p482_p2 = scmp.lt.s32.totalorder %s480_s8, %s476_s5 }
  0x1b   : > { %p478_p13 = pnand %p477_p12, %p603_p4  ;;  %p483_p3 = por %p482_p2, %p481_p1 }
  0x1d   : > { %p479_p0 = pneg %p478_p13 }
  0x1e   : > { %212 = vperm.xlu0 %459, %v204_v3  }
  0x1f   : > { %p484_p5 = pnand %p483_p3, %p479_p0 }
  0x20   : > { %v217_v6 = vld.sshfl [vmem:[#allocation1] sm:$0xff pattern:$0x75316420]  ;;  %v218_v7 = vld.sshfl [vmem:[#allocation1 + $0x8] sm:$0xff pattern:$0x75316420] }
  0x21   : > { %386 = vmatpush.msk.msra.mxu0 %vm226_vm0, %v217_v6  ;;  %399 = vmatpush.msk.msra.mxu2 %vm226_vm0, %v217_v6 }
  0x22   : > { %389 = vmatpush.msk.msra.mxu1 %vm226_vm0, %v218_v7  ;;  %400 = vmatpush.msk.msra.mxu3 %vm226_vm0, %v218_v7 }
  0x23   : > { %387 = vmatmul.msk.f32.vlgmr.msra.gmra.mxu0 %vm219_vm1, %v200_v4  ;;  %388 = vmatmul.msk.f32.vlgmr.msra.gmra.mxu2 %vm219_vm1, %v201_v5 }
  0x24   : > { %390 = vmatmul.msk.f32.vlgmr.msra.gmra.mxu1 %vm219_vm1, %v200_v4  ;;  %391 = vmatmul.msk.f32.vlgmr.msra.gmra.mxu3 %vm219_vm1, %v201_v5 }
  0x88   : > { %v208_v8 = vpop.permute.xlu0 %207 }
  0x90   : > { %v213_v13 = vpop.permute.xlu0 %212 }
  0xa0   : > { %v248_v9 = vpop.f32.mrf.mxu0 }
  0xa1   : > { %v249_v10 = vadd.f32 %v248_v9, %v208_v8  ;;  %v271_v11 = vpop.f32.mrf.mxu1 }
  0xa2   : > { %v272_v12 = vadd.f32 %v271_v11, %v208_v8 }
  0xa3   : > { %277 = vst [vmem:[%s188_s28] sm:$0xff] %v249_v10 }
  0xa4   : > { %278 = vst [vmem:[%s188_s28 + $0x8] sm:$0xff] %v272_v12 }
  0xa6   : > { %v251_v14 = vpop.f32.mrf.mxu2 }
  0xa7   : > { %v252_v15 = vadd.f32 %v251_v14, %v213_v13  ;;  %v274_v16 = vpop.f32.mrf.mxu3 }
  0xa8   : > { %v275_v17 = vadd.f32 %v274_v16, %v213_v13 }
  0xa9   : > { %279 = vst [vmem:[%s188_s28 + $0x10] sm:$0xff] %v252_v15 }
  0xaa   : > { %280 = vst [vmem:[%s188_s28 + $0x18] sm:$0xff] %v275_v17 }
  0xab   : > { %487 = shalt.err (!%p484_p5)
}
  0xac   : > { %s541_s11 = smov 256   ;;  %s542_s18 = smov 16  }
  0xad   : > { %401 = dma.vmem_to_hbm [thread:$0]  (%p603_p4), %s297_s29, 512, %s299_s30, %s282_s15, %s541_s11, %s541_s11, %s542_s18  }
  0xae PF: > { %p407_p6 = scmp.ge.s32.totalorder %s538_s17, 2  ;;  %s313_s19 = sand.u32 1, %s518_s12  }
  0xaf   : > { %s314_s21 = scalar_lea.sflag [#allocation3], %s313_s19 }
  0xb0   : > { %p404_p7 = pnand %p407_p6, %p610_p8 }
  0xb2   : > { %p405_p9 = pneg %p404_p7 }
  0xb4   : > { %513 = dma.done.wait (%p405_p9), %s314_s21, 512  }
  0xb5   : > { %515 = vsyncadd (%p405_p9), %s314_s21, 4294966784  ;;  %s16_s17 = sadd.s32 1, %s538_s17   ;;  %s678_s12 = smov %s522_s13 }
  0xb6   : > { %p13_p10 = scmp.ge.s32.totalorder %s16_s17, 4   ;;  %s679_s13 = smov %s526_s14 }
  0xb7   : > { %s680_s14 = smov %s616_s25  ;;  %s681_s15 = smov %s534_s16 }
  0xb8   : > { %s682_s16 = smov %s684_s20  ;;  %15 = sbr.rel (!%p13_p10) target bundleno = 4 (0x4), region = 67 }
  0xbd   :  { %320 = vsyncpa [#allocation3], 1 }
  0xbe   :  { %322 = vsyncpa [#allocation3 + $0x1], 1 }

</bundles_post_ra>
